<compile_context>
chip_gen: v7x
topology: tpu7x:2x2x1
jax: 0.10.0
libtpu: 0.0.40
codegen_flags: <defaults>
</compile_context>

<pallas_src>
import functools

import jax
import jax.numpy as jnp
from jax import lax
from jax.experimental import pallas as pl
from jax.experimental.pallas import tpu as pltpu

LANE = 128
SUBLANE = 8


def _round_up(x, m):
    return (x + m - 1) // m * m


def _mlp_kernel(n_layers, x_ref, w0_ref, w_ref, b_ref, out_ref):
    """Fused MLP forward on one batch tile (batch on the lane axis).

    x_ref:   (TB, K)      f32  input tile (feature dim NOT padded to 128)
    w0_ref:  (P, K)       cdt  first-layer weight, PyTorch (out, in) layout
    w_ref:   (L-1, P, P)  cdt  remaining weights, (out, in) layout, zero-padded
    b_ref:   (L, P, 1)    f32  biases, zero-padded
    out_ref: (1, TB)      f32  lane-dense output row
    """
    cdt = w0_ref.dtype
    x = x_ref[...].astype(cdt)                               # (TB, K)
    # Layer 0: H = W0 @ X^T  -> (P, TB); features on sublanes, batch on lanes.
    h = lax.dot_general(
        w0_ref[...], x,
        dimension_numbers=(((1,), (1,)), ((), ())),
        preferred_element_type=jnp.float32)
    h = h + b_ref[0]                                         # (P,1) lane-broadcast
    for i in range(1, n_layers):                             # statically unrolled
        h = jnp.maximum(h, 0.0)                              # ReLU on hidden layers
        h = jnp.dot(w_ref[i - 1], h.astype(cdt),
                    preferred_element_type=jnp.float32) + b_ref[i]
    # Only row 0 of the final (P, TB) is real (out_dim == 1): lane-dense store.
    out_ref[...] = h[0:1, :].astype(out_ref.dtype)


def pack_params(weights, biases, *, compute_dtype=jnp.float32):
    """One-time packing (hoisted out of the forward hot path).

    weights[i]: (d_out, d_in)  -- PyTorch nn.Linear layout.  biases[i]: (d_out,)
    """
    n_layers = len(weights)
    assert n_layers >= 2
    input_dim = weights[0].shape[1]
    out_dims = [w.shape[0] for w in weights]
    P = _round_up(max(out_dims), LANE)          # padded hidden/output dim (128 here)
    K_pad = _round_up(input_dim, SUBLANE)       # feature dim, NOT padded to 128

    w0 = jnp.zeros((P, K_pad), compute_dtype)
    w0 = w0.at[:out_dims[0], :input_dim].set(weights[0].astype(compute_dtype))
    w_rest = jnp.zeros((n_layers - 1, P, P), compute_dtype)
    b = jnp.zeros((n_layers, P, 1), jnp.float32)
    b = b.at[0, :out_dims[0], 0].set(biases[0].astype(jnp.float32))
    for i in range(1, n_layers):
        d_out, d_in = weights[i].shape
        w_rest = w_rest.at[i - 1, :d_out, :d_in].set(weights[i].astype(compute_dtype))
        b = b.at[i, :d_out, 0].set(biases[i].astype(jnp.float32))
    return {"w0": w0, "w_rest": w_rest, "b": b}


def mlp_forward_batched(x, packed, *, batch_tile=None):
    """x: (B, input_dim) f32.  packed: output of pack_params.  Returns (B, 1) f32."""
    w0, w_rest, b = packed["w0"], packed["w_rest"], packed["b"]
    n_layers = b.shape[0]
    P, K_pad = w0.shape
    B, input_dim = x.shape
    assert input_dim <= K_pad

    B8 = _round_up(B, SUBLANE)
    if batch_tile is None:
        # Single step up to 256 rows; larger batches stream 256-row tiles
        # (multiple of 128 -> lane-dense output blocks).  Sweep via batch_tile.
        TB = B8 if B8 <= 256 else 256
    else:
        TB = _round_up(int(batch_tile), SUBLANE)
    B_pad = _round_up(max(B, TB), TB)
    if TB != B_pad and TB % LANE != 0:
        raise ValueError("batch_tile must be a multiple of 128 when it induces "
                         "multiple grid steps (got %d for B=%d)" % (TB, B))

    if x.shape == (B_pad, K_pad) and x.dtype == jnp.float32:
        x_p = x
    else:
        x_p = jnp.zeros((B_pad, K_pad), jnp.float32).at[:B, :input_dim].set(
            x.astype(jnp.float32))

    grid = (B_pad // TB,)
    kernel = functools.partial(_mlp_kernel, n_layers)
    y = pl.pallas_call(
        kernel,
        out_shape=jax.ShapeDtypeStruct((1, B_pad), jnp.float32),
        grid=grid,
        in_specs=[
            pl.BlockSpec((TB, K_pad), lambda i: (i, 0)),               # x streams
            pl.BlockSpec((P, K_pad), lambda i: (0, 0)),                # w0 resident
            pl.BlockSpec((n_layers - 1, P, P), lambda i: (0, 0, 0)),   # w_rest resident
            pl.BlockSpec((n_layers, P, 1), lambda i: (0, 0, 0)),       # biases resident
        ],
        out_specs=pl.BlockSpec((1, TB), lambda i: (0, i)),             # lane-dense out
        compiler_params=pltpu.CompilerParams(
            dimension_semantics=("parallel",)),
    )(x_p, w0, w_rest, b)
    return y[0, :B].reshape(B, 1)


def mlp_forward(x_flat, packed):
    """Single-input forward matching the PyTorch module: (input_dim,) -> (1,).

    NOTE: at B=1 plain XLA is as fast as the kernel (one-step grid is pure
    overhead); kept on the kernel path for demonstration / parity testing.
    """
    return mlp_forward_batched(x_flat.reshape(1, -1), packed).reshape(-1)


def init_params(key, input_dim, depth, width):
    """Deterministic init matching the PyTorch module's layer shapes.

    Weights are in PyTorch nn.Linear layout (d_out, d_in)."""
    dims = [input_dim] + [width] * depth + [1]
    weights, biases = [], []
    for i in range(len(dims) - 1):
        key, kw, kb = jax.random.split(key, 3)
        d_in, d_out = dims[i], dims[i + 1]
        bound = 1.0 / jnp.sqrt(d_in)
        w = jax.random.uniform(kw, (d_out, d_in), jnp.float32, -bound, bound)
        b = jax.random.uniform(kb, (d_out,), jnp.float32, -bound, bound)
        weights.append(w)
        biases.append(b)
    return weights, biases


def reference_forward_batched(X, weights, biases):
    h = X
    n = len(weights)
    for i in range(n):
        h = h @ weights[i].T + biases[i][None, :]
        if i < n - 1:
            h = jnp.maximum(h, 0.0)
    return h


if __name__ == "__main__":
    key = jax.random.PRNGKey(0)

    # Small synthetic "graph" feature matrix: 8 nodes x 8 features.
    num_nodes, num_feats = 8, 8
    input_dim = num_nodes * num_feats
    depth, width = 3, 32

    key, kfeat = jax.random.split(key)
    feat_mat = jax.random.uniform(kfeat, (num_nodes, num_feats), jnp.float32)

    # TODO(synk): Graph.feat_mat_normed() / feat_mat_aggr_normed() come from an
    # external graph library; a simple per-row L1 normalization stands in here
    # as plain-JAX glue (not part of the kernel hot path).
    feat_mat = feat_mat / jnp.maximum(
        jnp.sum(jnp.abs(feat_mat), axis=1, keepdims=True), 1e-12)
    x_flat = feat_mat.reshape(-1)  # torch.flatten(feat_mat)

    weights, biases = init_params(key, input_dim, depth, width)

    # One-time packing, hoisted out of the forward hot path.
    packed_f32 = pack_params(weights, biases, compute_dtype=jnp.float32)

    # Single-input forward (matches the PyTorch module semantics).
    out = jax.block_until_ready(jax.jit(mlp_forward)(x_flat, packed_f32))
    ref = reference_forward_batched(x_flat.reshape(1, -1), weights, biases).reshape(-1)
    assert out.shape == (1,)
    assert jnp.allclose(out, ref, atol=1e-5, rtol=1e-5), (out, ref)

    # Batched streaming path: B=384 -> TB=256, 2 grid steps (weights stay
    # VMEM-resident; both v7x TensorCores get work).
    key, kb_ = jax.random.split(key)
    X = jax.random.uniform(kb_, (384, input_dim), jnp.float32)
    fwd = jax.jit(mlp_forward_batched)
    out_b = jax.block_until_ready(fwd(X, packed_f32))
    ref_b = reference_forward_batched(X, weights, biases)
    assert out_b.shape == (384, 1)
    assert jnp.allclose(out_b, ref_b, atol=1e-4, rtol=1e-4)

    # bf16 weights/activations (native MXU path on v6e/v7x), f32 accumulation.
    packed_bf16 = pack_params(weights, biases, compute_dtype=jnp.bfloat16)
    out_bf = jax.block_until_ready(fwd(X, packed_bf16))
    assert jnp.allclose(out_bf, ref_b, atol=1e-1, rtol=1e-1)

    print("KERNEL_OK")
</pallas_src>

<mosaic_0001>
module attributes {stable_mosaic.version = 11 : i64} {
  func.func @_mlp_kernel(%arg0: i32, %arg1: memref<8x64xf32, #tpu.memory_space<vmem>>, %arg2: memref<128x64xf32, #tpu.memory_space<vmem>>, %arg3: memref<3x128x128xf32, #tpu.memory_space<vmem>>, %arg4: memref<4x128x1xf32, #tpu.memory_space<vmem>>, %arg5: memref<1x8xf32, #tpu.memory_space<vmem>>) attributes {dimension_semantics = [#tpu.dimension_semantics<parallel>], iteration_bounds = array<i64: 1>, scalar_prefetch = 0 : i64, scratch_operands = 0 : i64, tpu.core_type = #tpu.core_type<tc>, window_params = [{transform_indices = @transform_0, window_bounds = array<i64: 8, 64>}, {pipeline_mode = #tpu.pipeline_mode<synchronous>, transform_indices = @transform_1, window_bounds = array<i64: 128, 64>}, {pipeline_mode = #tpu.pipeline_mode<synchronous>, transform_indices = @transform_2, window_bounds = array<i64: 3, 128, 128>}, {pipeline_mode = #tpu.pipeline_mode<synchronous>, transform_indices = @transform_3, window_bounds = array<i64: 4, 128, 1>}, {transform_indices = @transform_4, window_bounds = array<i64: 1, 8>}]} {
    %c0 = arith.constant 0 : index
    %c0_0 = arith.constant 0 : index
    %0 = vector.load %arg1[%c0, %c0_0] : memref<8x64xf32, #tpu.memory_space<vmem>>, vector<8x64xf32>
    %c0_1 = arith.constant 0 : index
    %c0_2 = arith.constant 0 : index
    %1 = vector.load %arg2[%c0_1, %c0_2] : memref<128x64xf32, #tpu.memory_space<vmem>>, vector<128x64xf32>
    %cst = arith.constant dense<0.000000e+00> : vector<128x8xf32>
    %2 = tpu.matmul %1, %0, %cst {dimension_numbers = #tpu.dot_dimension_numbers<[1], [1], [0], [0], [0, 0, 1, 0], [], []>} : vector<128x64xf32>, vector<8x64xf32>, vector<128x8xf32> -> vector<128x8xf32>
    %c0_3 = arith.constant 0 : index
    %c0_4 = arith.constant 0 : index
    %c0_5 = arith.constant 0 : index
    %3 = vector.load %arg4[%c0_3, %c0_4, %c0_5] : memref<4x128x1xf32, #tpu.memory_space<vmem>>, vector<1x128x1xf32>
    %4 = vector.shape_cast %3 : vector<1x128x1xf32> to vector<128x1xf32>
    %5 = vector.broadcast %4 : vector<128x1xf32> to vector<128x8xf32>
    %6 = arith.addf %2, %5 : vector<128x8xf32>
    %cst_6 = arith.constant 0.000000e+00 : f32
    %7 = vector.broadcast %cst_6 : f32 to vector<128x8xf32>
    %8 = arith.maximumf %6, %7 : vector<128x8xf32>
    %c0_7 = arith.constant 0 : index
    %c0_8 = arith.constant 0 : index
    %c0_9 = arith.constant 0 : index
    %9 = vector.load %arg3[%c0_7, %c0_8, %c0_9] : memref<3x128x128xf32, #tpu.memory_space<vmem>>, vector<1x128x128xf32>
    %10 = vector.shape_cast %9 : vector<1x128x128xf32> to vector<128x128xf32>
    %cst_10 = arith.constant dense<0.000000e+00> : vector<128x8xf32>
    %11 = tpu.matmul %10, %8, %cst_10 {dimension_numbers = #tpu.dot_dimension_numbers<[1], [0], [0], [1], [0, 0, 1, 1], [], []>} : vector<128x128xf32>, vector<128x8xf32>, vector<128x8xf32> -> vector<128x8xf32>
    %c1 = arith.constant 1 : index
    %c0_11 = arith.constant 0 : index
    %c0_12 = arith.constant 0 : index
    %12 = vector.load %arg4[%c1, %c0_11, %c0_12] : memref<4x128x1xf32, #tpu.memory_space<vmem>>, vector<1x128x1xf32>
    %13 = vector.shape_cast %12 : vector<1x128x1xf32> to vector<128x1xf32>
    %14 = vector.broadcast %13 : vector<128x1xf32> to vector<128x8xf32>
    %15 = arith.addf %11, %14 : vector<128x8xf32>
    %cst_13 = arith.constant 0.000000e+00 : f32
    %16 = vector.broadcast %cst_13 : f32 to vector<128x8xf32>
    %17 = arith.maximumf %15, %16 : vector<128x8xf32>
    %c1_14 = arith.constant 1 : index
    %c0_15 = arith.constant 0 : index
    %c0_16 = arith.constant 0 : index
    %18 = vector.load %arg3[%c1_14, %c0_15, %c0_16] : memref<3x128x128xf32, #tpu.memory_space<vmem>>, vector<1x128x128xf32>
    %19 = vector.shape_cast %18 : vector<1x128x128xf32> to vector<128x128xf32>
    %cst_17 = arith.constant dense<0.000000e+00> : vector<128x8xf32>
    %20 = tpu.matmul %19, %17, %cst_17 {dimension_numbers = #tpu.dot_dimension_numbers<[1], [0], [0], [1], [0, 0, 1, 1], [], []>} : vector<128x128xf32>, vector<128x8xf32>, vector<128x8xf32> -> vector<128x8xf32>
    %c2 = arith.constant 2 : index
    %c0_18 = arith.constant 0 : index
    %c0_19 = arith.constant 0 : index
    %21 = vector.load %arg4[%c2, %c0_18, %c0_19] : memref<4x128x1xf32, #tpu.memory_space<vmem>>, vector<1x128x1xf32>
    %22 = vector.shape_cast %21 : vector<1x128x1xf32> to vector<128x1xf32>
    %23 = vector.broadcast %22 : vector<128x1xf32> to vector<128x8xf32>
    %24 = arith.addf %20, %23 : vector<128x8xf32>
    %cst_20 = arith.constant 0.000000e+00 : f32
    %25 = vector.broadcast %cst_20 : f32 to vector<128x8xf32>
    %26 = arith.maximumf %24, %25 : vector<128x8xf32>
    %c2_21 = arith.constant 2 : index
    %c0_22 = arith.constant 0 : index
    %c0_23 = arith.constant 0 : index
    %27 = vector.load %arg3[%c2_21, %c0_22, %c0_23] : memref<3x128x128xf32, #tpu.memory_space<vmem>>, vector<1x128x128xf32>
    %28 = vector.shape_cast %27 : vector<1x128x128xf32> to vector<128x128xf32>
    %cst_24 = arith.constant dense<0.000000e+00> : vector<128x8xf32>
    %29 = tpu.matmul %28, %26, %cst_24 {dimension_numbers = #tpu.dot_dimension_numbers<[1], [0], [0], [1], [0, 0, 1, 1], [], []>} : vector<128x128xf32>, vector<128x8xf32>, vector<128x8xf32> -> vector<128x8xf32>
    %c3 = arith.constant 3 : index
    %c0_25 = arith.constant 0 : index
    %c0_26 = arith.constant 0 : index
    %30 = vector.load %arg4[%c3, %c0_25, %c0_26] : memref<4x128x1xf32, #tpu.memory_space<vmem>>, vector<1x128x1xf32>
    %31 = vector.shape_cast %30 : vector<1x128x1xf32> to vector<128x1xf32>
    %32 = vector.broadcast %31 : vector<128x1xf32> to vector<128x8xf32>
    %33 = arith.addf %29, %32 : vector<128x8xf32>
    %34 = vector.extract_strided_slice %33 {offsets = [0, 0], sizes = [1, 8], strides = [1, 1]} : vector<128x8xf32> to vector<1x8xf32>
    %c0_27 = arith.constant 0 : index
    %c0_28 = arith.constant 0 : index
    %35 = vector.load %arg5[%c0_27, %c0_28] : memref<1x8xf32, #tpu.memory_space<vmem>>, vector<1x8xf32>
    tpu.vector_store %arg5[%c0_27, %c0_28], %34 {strides = array<i32>} : memref<1x8xf32, #tpu.memory_space<vmem>>, vector<1x8xf32>,
    return
  }
  func.func @transform_0(%arg0: i32) -> (i32, i32) {
    %c0_i32 = arith.constant 0 : i32
    %c0_i32_0 = arith.constant 0 : i32
    return %arg0, %c0_i32 : i32, i32
  }
  func.func @transform_1(%arg0: i32) -> (i32, i32) {
    %c0_i32 = arith.constant 0 : i32
    %c0_i32_0 = arith.constant 0 : i32
    %c0_i32_1 = arith.constant 0 : i32
    return %c0_i32, %c0_i32_0 : i32, i32
  }
  func.func @transform_2(%arg0: i32) -> (i32, i32, i32) {
    %c0_i32 = arith.constant 0 : i32
    %c0_i32_0 = arith.constant 0 : i32
    %c0_i32_1 = arith.constant 0 : i32
    %c0_i32_2 = arith.constant 0 : i32
    return %c0_i32, %c0_i32_0, %c0_i32_1 : i32, i32, i32
  }
  func.func @transform_3(%arg0: i32) -> (i32, i32, i32) {
    %c0_i32 = arith.constant 0 : i32
    %c0_i32_0 = arith.constant 0 : i32
    %c0_i32_1 = arith.constant 0 : i32
    %c0_i32_2 = arith.constant 0 : i32
    return %c0_i32, %c0_i32_0, %c0_i32_1 : i32, i32, i32
  }
  func.func @transform_4(%arg0: i32) -> (i32, i32) {
    %c0_i32 = arith.constant 0 : i32
    %c0_i32_0 = arith.constant 0 : i32
    return %c0_i32, %arg0 : i32, i32
  }
}

</mosaic_0001>

<bundles_post_ra>
// kernel: mlp_forward.1
= control target key start
LH: loop header
LB: loop body
LE: loop exit
PB: predicated region body
PF: predicated region fallthrough
CT: control target
= control target key end

     0   :  { %vm131_vm0 = vcmask 523264   ;;  %v1682_v3 = vmov 0   ;;  %s2081_s0 = inlined_call_operand.vmem [shape: f32[8,64], index: 0, kind: input, shape index: {}]   ;;  %s2082_s1 = inlined_call_operand.vmem [shape: f32[128,64], index: 1, kind: input, shape index: {}]   ;;  %s2083_s2 = inlined_call_operand.vmem [shape: f32[3,128,128], index: 2, kind: input, shape index: {}]   ;;  %s2084_s3 = inlined_call_operand.vmem [shape: f32[4,128,1], index: 3, kind: input, shape index: {}]   ;;  %s2085_s4 = inlined_call_operand.hbm [shape: f32[1,8], index: 4, kind: output, shape index: {}]  }
   0x1   :  { %v18_v0 = vld [vmem:[%s2081_s0] sm:$0xff]  ;;  %v37_v1 = vld [vmem:[%s2084_s3 + $0x10] sm:$0xff]  ;;  %1657 = vset.pattern.permute.xlu1 %v1682_v3  ;;  %1656 = vset.pattern.permute.xlu0 %v1682_v3  ;;  %v20_v5 = vld [vmem:[%s2082_s1 + $0x8] sm:$0xff] }
   0x2   :  { %v35_v2 = vld [vmem:[%s2084_s3] sm:$0xff]  ;;  %1348 = vmatprep.subr.msk.mxu0 %vm131_vm0, %v18_v0  ;;  %63 = vperm.xlu1 %1657, %v37_v1   ;;  %v38_v6 = vld [vmem:[%s2084_s3 + $0x18] sm:$0xff]  ;;  %v36_v7 = vld [vmem:[%s2084_s3 + $0x8] sm:$0xff] }
   0x3   :  { %v19_v4 = vld [vmem:[%s2082_s1] sm:$0xff]  ;;  %53 = vperm.xlu0 %1656, %v35_v2   ;;  %1349 = vmatpush3.xpose.msk.msra.mxu0 %vm131_vm0, %v18_v0  ;;  %v21_v8 = vld [vmem:[%s2082_s1 + $0x10] sm:$0xff]  ;;  %v22_v9 = vld [vmem:[%s2082_s1 + $0x18] sm:$0xff] }
   0x4   :  { %1350 = vmatprep.mubr.msk.f32.mxu0 %vm131_vm0, %v19_v4  ;;  %v40_v10 = vld [vmem:[%s2084_s3 + $0x28] sm:$0xff]  ;;  %v39_v11 = vld [vmem:[%s2084_s3 + $0x20] sm:$0xff]  ;;  %v42_v14 = vld [vmem:[%s2084_s3 + $0x38] sm:$0xff] }
   0x5   :  { %v23_v12 = vld [vmem:[%s2082_s1 + $0x20] sm:$0xff]  ;;  %v24_v13 = vld [vmem:[%s2082_s1 + $0x28] sm:$0xff]  ;;  %v41_v15 = vld [vmem:[%s2084_s3 + $0x30] sm:$0xff] }
   0x6   :  { %1351 = vmatmul.mubr.msk.f32.vlgmr.msra.gmra.mrb[0].mxu0 %vm131_vm0, %v20_v5  ;;  %68 = vperm.xlu1 %1657, %v38_v6   ;;  %v25_v16 = vld [vmem:[%s2082_s1 + $0x30] sm:$0xff]  ;;  %v26_v17 = vld [vmem:[%s2082_s1 + $0x38] sm:$0xff]  ;;  %v44_v18 = vld [vmem:[%s2084_s3 + $0x48] sm:$0xff] }
   0x7   :  { %58 = vperm.xlu0 %1656, %v36_v7   ;;  %1353 = vmatprep.mubr.msk.f32.mxu0 %vm131_vm0, %v21_v8  ;;  %v43_v19 = vld [vmem:[%s2084_s3 + $0x40] sm:$0xff]  ;;  %v28_v21 = vld [vmem:[%s2082_s1 + $0x48] sm:$0xff]  ;;  %v46_v22 = vld [vmem:[%s2084_s3 + $0x58] sm:$0xff] }
   0x8   :  { %v27_v20 = vld [vmem:[%s2082_s1 + $0x40] sm:$0xff]  ;;  %v45_v23 = vld [vmem:[%s2084_s3 + $0x50] sm:$0xff] }
   0x9   :  { %v29_v24 = vld [vmem:[%s2082_s1 + $0x50] sm:$0xff] }
   0xa   :  { %1354 = vmatmul.mubr.msk.f32.gmra.mrb[2].mxu0 %vm131_vm0, %v22_v9  ;;  %78 = vperm.xlu1 %1657, %v40_v10  }
   0xb   :  { %73 = vperm.xlu0 %1656, %v39_v11   ;;  %1356 = vmatprep.mubr.msk.f32.mxu0 %vm131_vm0, %v23_v12 }
   0xe   :  { %1357 = vmatmul.mubr.msk.f32.gmra.mrb[4].mxu0 %vm131_vm0, %v24_v13  ;;  %88 = vperm.xlu1 %1657, %v42_v14  }
   0xf   :  { %83 = vperm.xlu0 %1656, %v41_v15   ;;  %1359 = vmatprep.mubr.msk.f32.mxu0 %vm131_vm0, %v25_v16 }
  0x12   :  { %1360 = vmatmul.mubr.msk.f32.gmra.mrb[6].mxu0 %vm131_vm0, %v26_v17  ;;  %98 = vperm.xlu1 %1657, %v44_v18  }
  0x13   :  { %93 = vperm.xlu0 %1656, %v43_v19   ;;  %1362 = vmatprep.mubr.msk.f32.mxu0 %vm131_vm0, %v27_v20 }
  0x16   :  { %1363 = vmatmul.mubr.msk.f32.gmra.mrb[8].mxu0 %vm131_vm0, %v28_v21  ;;  %108 = vperm.xlu1 %1657, %v46_v22  }
  0x17   :  { %9 = vsyncpa [#allocation3], 0  ;;  %103 = vperm.xlu0 %1656, %v45_v23   ;;  %1365 = vmatprep.mubr.msk.f32.mxu0 %vm131_vm0, %v29_v24  ;;  %v30_v25 = vld [vmem:[%s2082_s1 + $0x58] sm:$0xff]  ;;  %v48_v26 = vld [vmem:[%s2084_s3 + $0x68] sm:$0xff]  ;;  %s1683_s17 = smov [#allocation2]   ;;  %vm1122_vm1 = vcmask 57344  }
  0x18   :  { %v47_v27 = vld [vmem:[%s2084_s3 + $0x60] sm:$0xff]  ;;  %v32_v29 = vld [vmem:[%s2082_s1 + $0x68] sm:$0xff]  ;;  %v50_v30 = vld [vmem:[%s2084_s3 + $0x78] sm:$0xff]  ;;  %s1130_s18 = sshll.u32 %s1683_s17, 4  ;;  %s1131_s18 = int_to_ptr.vmem [resolvable:$true] %s1130_s18 }
  0x19   :  { %v31_v28 = vld [vmem:[%s2082_s1 + $0x60] sm:$0xff]  ;;  %v49_v31 = vld [vmem:[%s2084_s3 + $0x70] sm:$0xff]  ;;  %v34_v33 = vld [vmem:[%s2082_s1 + $0x78] sm:$0xff]  ;;  %s1658_s19 = scalar_lea.vmem %s1131_s18, 16  ;;  %s1662_s20 = scalar_lea.vmem %s1131_s18, 32 }
  0x1a   :  { %1366 = vmatmul.mubr.msk.f32.gmra.mrb[10].mxu0 %vm131_vm0, %v30_v25  ;;  %118 = vperm.xlu1 %1657, %v48_v26   ;;  %v33_v32 = vld [vmem:[%s2082_s1 + $0x70] sm:$0xff]  ;;  %v1156_v34 = vld [vmem:[%s2084_s3 + $0x88] sm:$0xff]  ;;  %v1155_v35 = vld [vmem:[%s2084_s3 + $0x80] sm:$0xff]  ;;  %p1659_p0 = scmp.ne.s32.totalorder %s1131_s18, %s1658_s19  ;;  %p1663_p1 = scmp.lt.s32.totalorder %s1131_s18, %s1131_s18 }
  0x1b   :  { %113 = vperm.xlu0 %1656, %v47_v27   ;;  %1368 = vmatprep.mubr.msk.f32.mxu0 %vm131_vm0, %v31_v28  ;;  %v1158_v36 = vld [vmem:[%s2084_s3 + $0x98] sm:$0xff]  ;;  %v1157_v37 = vld [vmem:[%s2084_s3 + $0x90] sm:$0xff]  ;;  %v1160_v38 = vld [vmem:[%s2084_s3 + $0xa8] sm:$0xff]  ;;  %p1664_p2 = scmp.lt.s32.totalorder %s1662_s20, %s1658_s19 }
  0x1c   :  { %v1159_v39 = vld [vmem:[%s2084_s3 + $0xa0] sm:$0xff]  ;;  %v1162_v40 = vld [vmem:[%s2084_s3 + $0xb8] sm:$0xff]  ;;  %v1161_v41 = vld [vmem:[%s2084_s3 + $0xb0] sm:$0xff] }
  0x1d   :  { %v1164_v42 = vld [vmem:[%s2084_s3 + $0xc8] sm:$0xff]  ;;  %v1163_v43 = vld [vmem:[%s2084_s3 + $0xc0] sm:$0xff]  ;;  %v1166_v44 = vld [vmem:[%s2084_s3 + $0xd8] sm:$0xff]  ;;  %p1665_p3 = por %p1664_p2, %p1663_p1 }
  0x1e   :  { %1369 = vmatmul.mubr.msk.f32.gmra.mrb[12].mxu0 %vm131_vm0, %v32_v29  ;;  %128 = vperm.xlu1 %1657, %v50_v30   ;;  %v1165_v45 = vld [vmem:[%s2084_s3 + $0xd0] sm:$0xff]  ;;  %v1168_v46 = vld [vmem:[%s2084_s3 + $0xe8] sm:$0xff]  ;;  %v1167_v47 = vld [vmem:[%s2084_s3 + $0xe0] sm:$0xff] }
  0x1f   :  { %123 = vperm.xlu0 %1656, %v49_v31   ;;  %1371 = vmatprep.mubr.msk.f32.mxu0 %vm131_vm0, %v33_v32  ;;  %v1170_v48 = vld [vmem:[%s2084_s3 + $0xf8] sm:$0xff]  ;;  %v1169_v49 = vld [vmem:[%s2084_s3 + $0xf0] sm:$0xff]  ;;  %v1188_v50 = vld [vmem:[%s2084_s3 + $0x108] sm:$0xff]  ;;  %p1666_p4 = pnand %p1665_p3, %p1659_p0 }
  0x20   :  { %v1187_v51 = vld [vmem:[%s2084_s3 + $0x100] sm:$0xff]  ;;  %v1190_v52 = vld [vmem:[%s2084_s3 + $0x118] sm:$0xff]  ;;  %v1189_v53 = vld [vmem:[%s2084_s3 + $0x110] sm:$0xff] }
  0x21   :  { %v1192_v54 = vld [vmem:[%s2084_s3 + $0x128] sm:$0xff]  ;;  %v1191_v55 = vld [vmem:[%s2084_s3 + $0x120] sm:$0xff]  ;;  %v1194_v56 = vld [vmem:[%s2084_s3 + $0x138] sm:$0xff] }
  0x22   :  { %1372 = vmatmul.mubr.msk.f32.gmra.mrb[14].mxu0 %vm131_vm0, %v34_v33  ;;  %384 = vperm.xlu1 %1657, %v1156_v34   ;;  %v1193_v57 = vld [vmem:[%s2084_s3 + $0x130] sm:$0xff]  ;;  %v1196_v58 = vld [vmem:[%s2084_s3 + $0x148] sm:$0xff]  ;;  %v1195_v59 = vld [vmem:[%s2084_s3 + $0x140] sm:$0xff] }
  0x23   :  { %379 = vperm.xlu0 %1656, %v1155_v35   ;;  %v1198_v60 = vld [vmem:[%s2084_s3 + $0x158] sm:$0xff]  ;;  %v1197_v61 = vld [vmem:[%s2084_s3 + $0x150] sm:$0xff]  ;;  %v1200_v62 = vld [vmem:[%s2084_s3 + $0x168] sm:$0xff] }
  0x24   :  { %v1199_v63 = vld [vmem:[%s2084_s3 + $0x160] sm:$0xff]  ;;  %v1202_v0 = vld [vmem:[%s2084_s3 + $0x178] sm:$0xff]  ;;  %v1201_v1 = vld [vmem:[%s2084_s3 + $0x170] sm:$0xff] }
  0x25   :  { %v1219_v2 = vld [vmem:[%s2084_s3 + $0x180] sm:$0xff] }
  0x26   :  { %394 = vperm.xlu1 %1657, %v1158_v36   ;;  %v344_v3 = vld [vmem:[%s2083_s2] sm:$0xff] }
  0x27   :  { %389 = vperm.xlu0 %1656, %v1157_v37   ;;  %1406 = vmatprep.mubr.f32.mxu1 %v344_v3 }
  0x2a   :  { %404 = vperm.xlu1 %1657, %v1160_v38  }
  0x2b   :  { %399 = vperm.xlu0 %1656, %v1159_v39  }
  0x2e   :  { %414 = vperm.xlu1 %1657, %v1162_v40  }
  0x2f   :  { %409 = vperm.xlu0 %1656, %v1161_v41  }
  0x32   :  { %424 = vperm.xlu1 %1657, %v1164_v42  }
  0x33   :  { %419 = vperm.xlu0 %1656, %v1163_v43  }
  0x36   :  { %434 = vperm.xlu1 %1657, %v1166_v44  }
  0x37   :  { %429 = vperm.xlu0 %1656, %v1165_v45  }
  0x3a   :  { %444 = vperm.xlu1 %1657, %v1168_v46  }
  0x3b   :  { %439 = vperm.xlu0 %1656, %v1167_v47  }
  0x3e   :  { %454 = vperm.xlu1 %1657, %v1170_v48  }
  0x3f   :  { %449 = vperm.xlu0 %1656, %v1169_v49  }
  0x42   :  { %659 = vperm.xlu1 %1657, %v1188_v50  }
  0x43   :  { %654 = vperm.xlu0 %1656, %v1187_v51  }
  0x46   :  { %669 = vperm.xlu1 %1657, %v1190_v52  }
  0x47   :  { %664 = vperm.xlu0 %1656, %v1189_v53  }
  0x4a   :  { %679 = vperm.xlu1 %1657, %v1192_v54  }
  0x4b   :  { %674 = vperm.xlu0 %1656, %v1191_v55  }
  0x4e   :  { %689 = vperm.xlu1 %1657, %v1194_v56  }
  0x4f   :  { %684 = vperm.xlu0 %1656, %v1193_v57  }
  0x52   :  { %699 = vperm.xlu1 %1657, %v1196_v58  }
  0x53   :  { %694 = vperm.xlu0 %1656, %v1195_v59  }
  0x56   :  { %709 = vperm.xlu1 %1657, %v1198_v60  }
  0x57   :  { %704 = vperm.xlu0 %1656, %v1197_v61  }
  0x5a   :  { %719 = vperm.xlu1 %1657, %v1200_v62  }
  0x5b   :  { %714 = vperm.xlu0 %1656, %v1199_v63  }
  0x5e   :  { %729 = vperm.xlu1 %1657, %v1202_v0  }
  0x5f   :  { %724 = vperm.xlu0 %1656, %v1201_v1  }
  0x63   :  { %929 = vperm.xlu0 %1656, %v1219_v2  }
  0x81   :  { %v64_v4 = vpop.permute.xlu1 %63 }
  0x82   :  { %v54_v5 = vpop.permute.xlu0 %53 }
  0x85   :  { %v69_v6 = vpop.permute.xlu1 %68 }
  0x86   :  { %v59_v7 = vpop.permute.xlu0 %58 }
  0x89   :  { %v79_v8 = vpop.permute.xlu1 %78 }
  0x8a   :  { %v74_v9 = vpop.permute.xlu0 %73 }
  0x8d   :  { %v89_v15 = vpop.permute.xlu1 %88 }
  0x8e   :  { %v84_v18 = vpop.permute.xlu0 %83 }
  0x91   :  { %v99_v28 = vpop.permute.xlu1 %98 }
  0x92   :  { %v94_v31 = vpop.permute.xlu0 %93 }
  0x95   :  { %v109_v40 = vpop.permute.xlu1 %108 }
  0x96   :  { %v104_v43 = vpop.permute.xlu0 %103 }
  0x99   :  { %v119_v53 = vpop.permute.xlu1 %118 }
  0x9a   :  { %v114_v56 = vpop.permute.xlu0 %113 }
  0x9d   :  { %v129_v1 = vpop.permute.xlu1 %128 }
  0xd9   :  { %v1352_v10 = vpop.f32.mrb[0].mxu0 }
  0xda   :  { %v255_v11 = vadd.f32 %v1352_v10, %v59_v7  ;;  %v249_v12 = vpop.f32.mrb[1].mxu0 }
  0xdb   :  { %v250_v13 = vadd.f32 %v249_v12, %v54_v5  ;;  %v345_v12 = vld [vmem:[%s2083_s2 + $0x8] sm:$0xff] }
  0xdc   :  { %v329_v14 = vmax.f32 %v255_v11, 0.0 }
  0xdd   :  { %v328_v16 = vmax.f32 %v250_v13, 0.0  ;;  %v1355_v17 = vpop.f32.mrb[2].mxu0  ;;  %v346_v13 = vld [vmem:[%s2083_s2 + $0x10] sm:$0xff] }
  0xde   :  { %v265_v19 = vadd.f32 %v1355_v17, %v69_v6  ;;  %v259_v20 = vpop.f32.mrb[3].mxu0  ;;  %v350_v17 = vld [vmem:[%s2083_s2 + $0x30] sm:$0xff] }
  0xdf   :  { %v260_v21 = vadd.f32 %v259_v20, %v64_v4  ;;  %v1542_v22 = vpack.c.bf16 %v329_v14, %v328_v16  ;;  %v124_v4 = vpop.permute.xlu0 %123  ;;  %v347_v14 = vld [vmem:[%s2083_s2 + $0x18] sm:$0xff]  ;;  %v349_v16 = vld [vmem:[%s2083_s2 + $0x28] sm:$0xff] }
  0xe0   :  { %v331_v23 = vmax.f32 %v265_v19, 0.0  ;;  %v352_v19 = vld [vmem:[%s2083_s2 + $0x40] sm:$0xff]  ;;  %v353_v20 = vld [vmem:[%s2083_s2 + $0x48] sm:$0xff] }
  0xe1   :  { %v330_v24 = vmax.f32 %v260_v21, 0.0  ;;  %v1358_v25 = vpop.f32.mrb[4].mxu0  ;;  %1543 = vmatprep.subr.bf16.mxu1 %v1542_v22  ;;  %v354_v21 = vld [vmem:[%s2083_s2 + $0x50] sm:$0xff] }
  0xe2   :  { %v275_v26 = vadd.f32 %v1358_v25, %v79_v8  ;;  %v269_v27 = vpop.f32.mrb[5].mxu0  ;;  %1545 = vmatpush3.bf16.msra.mxu1 %v1542_v22  ;;  %v355_v22 = vld [vmem:[%s2083_s2 + $0x58] sm:$0xff]  ;;  %v358_v25 = vld [vmem:[%s2083_s2 + $0x70] sm:$0xff] }
  0xe3   :  { %v1546_v29 = vpack.c.bf16 %v331_v23, %v330_v24  ;;  %v270_v30 = vadd.f32 %v269_v27, %v74_v9  ;;  %v356_v23 = vld [vmem:[%s2083_s2 + $0x60] sm:$0xff]  ;;  %v357_v24 = vld [vmem:[%s2083_s2 + $0x68] sm:$0xff] }
  0xe4   :  { %v333_v32 = vmax.f32 %v275_v26, 0.0  ;;  %v359_v26 = vld [vmem:[%s2083_s2 + $0x78] sm:$0xff]  ;;  %v1171_v27 = vld [vmem:[%s2083_s2 + $0x80] sm:$0xff] }
  0xe5   :  { %v332_v33 = vmax.f32 %v270_v30, 0.0  ;;  %v1361_v34 = vpop.f32.mrb[6].mxu0  ;;  %1547 = vmatprep.subr.bf16.mxu1 %v1546_v29  ;;  %1462 = vmatprep.mubr.f32.mxu0 %v1171_v27 }
  0xe6   :  { %v285_v35 = vadd.f32 %v1361_v34, %v89_v15  ;;  %v279_v36 = vpop.f32.mrb[7].mxu0  ;;  %1549 = vmatpush3.bf16.msra.mxu1 %v1546_v29  ;;  %v348_v15 = vld [vmem:[%s2083_s2 + $0x20] sm:$0xff]  ;;  %v380_v29 = vpop.permute.xlu0 %379 }
  0xe7   :  { %v1550_v37 = vpack.c.bf16 %v333_v32, %v332_v33  ;;  %v280_v38 = vadd.f32 %v279_v36, %v84_v18  ;;  %v351_v18 = vld [vmem:[%s2083_s2 + $0x38] sm:$0xff] }
  0xe8   :  { %v335_v39 = vmax.f32 %v285_v35, 0.0 }
  0xe9   :  { %v334_v41 = vmax.f32 %v280_v38, 0.0  ;;  %v1364_v42 = vpop.f32.mrb[8].mxu0  ;;  %1551 = vmatprep.subr.bf16.mxu1 %v1550_v37 }
  0xea   :  { %v295_v44 = vadd.f32 %v1364_v42, %v99_v28  ;;  %v289_v45 = vpop.f32.mrb[9].mxu0  ;;  %1553 = vmatpush3.bf16.msra.mxu1 %v1550_v37  ;;  %v385_v28 = vpop.permute.xlu1 %384 }
  0xeb   :  { %v1554_v46 = vpack.c.bf16 %v335_v39, %v334_v41  ;;  %v290_v47 = vadd.f32 %v289_v45, %v94_v31  ;;  %v390_v31 = vpop.permute.xlu0 %389 }
  0xec   :  { %v337_v48 = vmax.f32 %v295_v44, 0.0 }
  0xed   :  { %v336_v49 = vmax.f32 %v290_v47, 0.0  ;;  %v1367_v50 = vpop.f32.mrb[10].mxu0  ;;  %1555 = vmatprep.subr.bf16.mxu1 %v1554_v46 }
  0xee   :  { %v305_v51 = vadd.f32 %v1367_v50, %v109_v40  ;;  %v299_v52 = vpop.f32.mrb[11].mxu0  ;;  %1557 = vmatpush3.bf16.msra.mxu1 %v1554_v46  ;;  %v395_v30 = vpop.permute.xlu1 %394 }
  0xef   :  { %v1558_v54 = vpack.c.bf16 %v337_v48, %v336_v49  ;;  %v300_v55 = vadd.f32 %v299_v52, %v104_v43  ;;  %v400_v33 = vpop.permute.xlu0 %399 }
  0xf0   :  { %v339_v57 = vmax.f32 %v305_v51, 0.0 }
  0xf1   :  { %v338_v58 = vmax.f32 %v300_v55, 0.0  ;;  %v1370_v59 = vpop.f32.mrb[12].mxu0  ;;  %1559 = vmatprep.subr.bf16.mxu1 %v1558_v54 }
  0xf2   :  { %v315_v60 = vadd.f32 %v1370_v59, %v119_v53  ;;  %v309_v61 = vpop.f32.mrb[13].mxu0  ;;  %1561 = vmatpush3.bf16.msra.mxu1 %v1558_v54  ;;  %v405_v32 = vpop.permute.xlu1 %404 }
  0xf3   :  { %v1562_v62 = vpack.c.bf16 %v339_v57, %v338_v58  ;;  %v310_v63 = vadd.f32 %v309_v61, %v114_v56  ;;  %v410_v42 = vpop.permute.xlu0 %409 }
  0xf4   :  { %v341_v0 = vmax.f32 %v315_v60, 0.0 }
  0xf5   :  { %v340_v2 = vmax.f32 %v310_v63, 0.0  ;;  %v1373_v3 = vpop.f32.mrb[14].mxu0  ;;  %1563 = vmatprep.subr.bf16.mxu1 %v1562_v62 }
  0xf6   :  { %v325_v5 = vadd.f32 %v1373_v3, %v129_v1  ;;  %v319_v6 = vpop.f32.mrb[15].mxu0  ;;  %1565 = vmatpush3.bf16.msra.mxu1 %v1562_v62  ;;  %v415_v39 = vpop.permute.xlu1 %414 }
  0xf7   :  { %v1566_v7 = vpack.c.bf16 %v341_v0, %v340_v2  ;;  %v320_v8 = vadd.f32 %v319_v6, %v124_v4  ;;  %v420_v55 = vpop.permute.xlu0 %419 }
  0xf8   :  { %v343_v9 = vmax.f32 %v325_v5, 0.0 }
  0xf9   :  { %v342_v10 = vmax.f32 %v320_v8, 0.0  ;;  %1567 = vmatprep.subr.bf16.mxu1 %v1566_v7 }
  0xfa   :  { %1569 = vmatpush3.bf16.msra.mxu1 %v1566_v7  ;;  %v425_v52 = vpop.permute.xlu1 %424 }
  0xfb   :  { %v1570_v11 = vpack.c.bf16 %v343_v9, %v342_v10  ;;  %v430_v3 = vpop.permute.xlu0 %429 }
  0xfd   :  { %1571 = vmatprep.subr.bf16.mxu1 %v1570_v11 }
  0xfe   :  { %1573 = vmatpush3.bf16.msra.mxu1 %v1570_v11  ;;  %v435_v0 = vpop.permute.xlu1 %434 }
 0x101   :  { %1407 = vmatmul.mubr.f32.vlgmr.msra.gmra.mrb[0].mxu1 %v345_v12 }
 0x102   :  { %1409 = vmatprep.mubr.f32.mxu1 %v346_v13  ;;  %v445_v13 = vpop.permute.xlu1 %444 }
 0x105   :  { %1410 = vmatmul.mubr.f32.gmra.mrb[2].mxu1 %v347_v14 }
 0x106   :  { %1412 = vmatprep.mubr.f32.mxu1 %v348_v15 }
 0x109   :  { %1413 = vmatmul.mubr.f32.gmra.mrb[4].mxu1 %v349_v16  ;;  %v440_v16 = vpop.permute.xlu0 %439 }
 0x10a   :  { %1415 = vmatprep.mubr.f32.mxu1 %v350_v17 }
 0x10d   :  { %1416 = vmatmul.mubr.f32.gmra.mrb[6].mxu1 %v351_v18 }
 0x10e   :  { %1418 = vmatprep.mubr.f32.mxu1 %v352_v19 }
 0x111   :  { %1419 = vmatmul.mubr.f32.gmra.mrb[8].mxu1 %v353_v20 }
 0x112   :  { %1421 = vmatprep.mubr.f32.mxu1 %v354_v21 }
 0x115   :  { %1422 = vmatmul.mubr.f32.gmra.mrb[10].mxu1 %v355_v22 }
 0x116   :  { %1424 = vmatprep.mubr.f32.mxu1 %v356_v23 }
 0x119   :  { %1425 = vmatmul.mubr.f32.gmra.mrb[12].mxu1 %v357_v24 }
 0x11a   :  { %1427 = vmatprep.mubr.f32.mxu1 %v358_v25  ;;  %v455_v25 = vpop.permute.xlu1 %454 }
 0x11d   :  { %1428 = vmatmul.mubr.f32.gmra.mrb[14].mxu1 %v359_v26 }
 0x1d4   :  { %v1408_v34 = vpop.f32.mrb[0].mxu1 }
 0x1d5   :  { %v529_v35 = vadd.f32 %v1408_v34, %v385_v28  ;;  %v523_v36 = vpop.f32.mrb[1].mxu1  ;;  %v450_v28 = vpop.permute.xlu0 %449 }
 0x1d6   :  { %v524_v37 = vadd.f32 %v523_v36, %v380_v29  ;;  %v1172_v36 = vld [vmem:[%s2083_s2 + $0x88] sm:$0xff] }
 0x1d7   :  { %v603_v38 = vmax.f32 %v529_v35, 0.0 }
 0x1d8   :  { %v602_v40 = vmax.f32 %v524_v37, 0.0  ;;  %v1411_v41 = vpop.f32.mrb[2].mxu1  ;;  %v1173_v37 = vld [vmem:[%s2083_s2 + $0x90] sm:$0xff] }
 0x1d9   :  { %v539_v43 = vadd.f32 %v1411_v41, %v395_v30  ;;  %v533_v44 = vpop.f32.mrb[3].mxu1  ;;  %v1177_v41 = vld [vmem:[%s2083_s2 + $0xb0] sm:$0xff] }
 0x1da   :  { %v1574_v45 = vpack.c.bf16 %v603_v38, %v602_v40  ;;  %v534_v46 = vadd.f32 %v533_v44, %v390_v31  ;;  %v1174_v38 = vld [vmem:[%s2083_s2 + $0x98] sm:$0xff]  ;;  %v1176_v40 = vld [vmem:[%s2083_s2 + $0xa8] sm:$0xff] }
 0x1db   :  { %v605_v47 = vmax.f32 %v539_v43, 0.0  ;;  %v1179_v43 = vld [vmem:[%s2083_s2 + $0xc0] sm:$0xff]  ;;  %v1180_v44 = vld [vmem:[%s2083_s2 + $0xc8] sm:$0xff] }
 0x1dc   :  { %v604_v48 = vmax.f32 %v534_v46, 0.0  ;;  %v1414_v49 = vpop.f32.mrb[4].mxu1  ;;  %1575 = vmatprep.subr.bf16.mxu0 %v1574_v45  ;;  %v1182_v46 = vld [vmem:[%s2083_s2 + $0xd8] sm:$0xff] }
 0x1dd   :  { %v549_v50 = vadd.f32 %v1414_v49, %v405_v32  ;;  %v543_v51 = vpop.f32.mrb[5].mxu1  ;;  %1577 = vmatpush3.bf16.msra.mxu0 %v1574_v45  ;;  %v1181_v45 = vld [vmem:[%s2083_s2 + $0xd0] sm:$0xff] }
 0x1de   :  { %v1578_v53 = vpack.c.bf16 %v605_v47, %v604_v48  ;;  %v544_v54 = vadd.f32 %v543_v51, %v400_v33  ;;  %v1183_v47 = vld [vmem:[%s2083_s2 + $0xe0] sm:$0xff]  ;;  %v1184_v48 = vld [vmem:[%s2083_s2 + $0xe8] sm:$0xff]  ;;  %v1185_v49 = vld [vmem:[%s2083_s2 + $0xf0] sm:$0xff] }
 0x1df   :  { %v607_v56 = vmax.f32 %v549_v50, 0.0  ;;  %v1186_v50 = vld [vmem:[%s2083_s2 + $0xf8] sm:$0xff]  ;;  %v1203_v51 = vld [vmem:[%s2083_s2 + $0x100] sm:$0xff] }
 0x1e0   :  { %v606_v57 = vmax.f32 %v544_v54, 0.0  ;;  %v1417_v58 = vpop.f32.mrb[6].mxu1  ;;  %1579 = vmatprep.subr.bf16.mxu0 %v1578_v53  ;;  %v655_v54 = vpop.permute.xlu0 %654 }
 0x1e1   :  { %v559_v59 = vadd.f32 %v1417_v58, %v415_v39  ;;  %v553_v60 = vpop.f32.mrb[7].mxu1  ;;  %1581 = vmatpush3.bf16.msra.mxu0 %v1578_v53  ;;  %v1175_v39 = vld [vmem:[%s2083_s2 + $0xa0] sm:$0xff]  ;;  %v660_v53 = vpop.permute.xlu1 %659 }
 0x1e2   :  { %v1582_v61 = vpack.c.bf16 %v607_v56, %v606_v57  ;;  %v554_v62 = vadd.f32 %v553_v60, %v410_v42  ;;  %v1178_v42 = vld [vmem:[%s2083_s2 + $0xb8] sm:$0xff] }
 0x1e3   :  { %v609_v63 = vmax.f32 %v559_v59, 0.0 }
 0x1e4   :  { %v608_v1 = vmax.f32 %v554_v62, 0.0  ;;  %v1420_v2 = vpop.f32.mrb[8].mxu1  ;;  %1583 = vmatprep.subr.bf16.mxu0 %v1582_v61  ;;  %v665_v56 = vpop.permute.xlu0 %664 }
 0x1e5   :  { %v569_v4 = vadd.f32 %v1420_v2, %v425_v52  ;;  %v563_v5 = vpop.f32.mrb[9].mxu1  ;;  %1585 = vmatpush3.bf16.msra.mxu0 %v1582_v61  ;;  %v1209_v52 = vld [vmem:[%s2083_s2 + $0x130] sm:$0xff] }
 0x1e6   :  { %v1586_v6 = vpack.c.bf16 %v609_v63, %v608_v1  ;;  %v564_v7 = vadd.f32 %v563_v5, %v420_v55  ;;  %1527 = vmatprep.mubr.f32.mxu1 %v1209_v52  ;;  %v670_v55 = vpop.permute.xlu1 %669 }
 0x1e7   :  { %v611_v8 = vmax.f32 %v569_v4, 0.0 }
 0x1e8   :  { %v610_v9 = vmax.f32 %v564_v7, 0.0  ;;  %v1423_v10 = vpop.f32.mrb[10].mxu1  ;;  %1587 = vmatprep.subr.bf16.mxu0 %v1586_v6  ;;  %v675_v58 = vpop.permute.xlu0 %674 }
 0x1e9   :  { %v579_v11 = vadd.f32 %v1423_v10, %v435_v0  ;;  %v573_v12 = vpop.f32.mrb[11].mxu1  ;;  %1589 = vmatpush3.bf16.msra.mxu0 %v1586_v6 }
 0x1ea   :  { %v1590_v14 = vpack.c.bf16 %v611_v8, %v610_v9  ;;  %v574_v15 = vadd.f32 %v573_v12, %v430_v3  ;;  %v680_v57 = vpop.permute.xlu1 %679 }
 0x1eb   :  { %v613_v17 = vmax.f32 %v579_v11, 0.0 }
 0x1ec   :  { %v612_v18 = vmax.f32 %v574_v15, 0.0  ;;  %v1426_v19 = vpop.f32.mrb[12].mxu1  ;;  %1591 = vmatprep.subr.bf16.mxu0 %v1590_v14  ;;  %v685_v3 = vpop.permute.xlu0 %684 }
 0x1ed   :  { %v589_v20 = vadd.f32 %v1426_v19, %v445_v13  ;;  %v583_v21 = vpop.f32.mrb[13].mxu1  ;;  %1593 = vmatpush3.bf16.msra.mxu0 %v1590_v14 }
 0x1ee   :  { %v1594_v22 = vpack.c.bf16 %v613_v17, %v612_v18  ;;  %v584_v23 = vadd.f32 %v583_v21, %v440_v16  ;;  %v690_v0 = vpop.permute.xlu1 %689 }
 0x1ef   :  { %v615_v24 = vmax.f32 %v589_v20, 0.0 }
 0x1f0   :  { %v614_v26 = vmax.f32 %v584_v23, 0.0  ;;  %v1429_v27 = vpop.f32.mrb[14].mxu1  ;;  %1595 = vmatprep.subr.bf16.mxu0 %v1594_v22  ;;  %v695_v16 = vpop.permute.xlu0 %694 }
 0x1f1   :  { %v599_v29 = vadd.f32 %v1429_v27, %v455_v25  ;;  %v593_v30 = vpop.f32.mrb[15].mxu1  ;;  %1597 = vmatpush3.bf16.msra.mxu0 %v1594_v22 }
 0x1f2   :  { %v1598_v31 = vpack.c.bf16 %v615_v24, %v614_v26  ;;  %v594_v32 = vadd.f32 %v593_v30, %v450_v28  ;;  %v700_v13 = vpop.permute.xlu1 %699 }
 0x1f3   :  { %v617_v33 = vmax.f32 %v599_v29, 0.0 }
 0x1f4   :  { %v616_v34 = vmax.f32 %v594_v32, 0.0  ;;  %1599 = vmatprep.subr.bf16.mxu0 %v1598_v31  ;;  %v705_v28 = vpop.permute.xlu0 %704 }
 0x1f5   :  { %1601 = vmatpush3.bf16.msra.mxu0 %v1598_v31 }
 0x1f6   :  { %v1602_v35 = vpack.c.bf16 %v617_v33, %v616_v34  ;;  %v710_v25 = vpop.permute.xlu1 %709 }
 0x1f8   :  { %1603 = vmatprep.subr.bf16.mxu0 %v1602_v35 }
 0x1f9   :  { %1605 = vmatpush3.bf16.msra.mxu0 %v1602_v35 }
 0x1fc   :  { %1463 = vmatmul.mubr.f32.vlgmr.msra.gmra.mrb[16].mxu0 %v1172_v36 }
 0x1fd   :  { %1465 = vmatprep.mubr.f32.mxu0 %v1173_v37 }
 0x200   :  { %1466 = vmatmul.mubr.f32.gmra.mrb[18].mxu0 %v1174_v38  ;;  %v720_v38 = vpop.permute.xlu1 %719 }
 0x201   :  { %1468 = vmatprep.mubr.f32.mxu0 %v1175_v39 }
 0x204   :  { %1469 = vmatmul.mubr.f32.gmra.mrb[20].mxu0 %v1176_v40 }
 0x205   :  { %1471 = vmatprep.mubr.f32.mxu0 %v1177_v41  ;;  %v715_v41 = vpop.permute.xlu0 %714 }
 0x208   :  { %1472 = vmatmul.mubr.f32.gmra.mrb[22].mxu0 %v1178_v42 }
 0x209   :  { %1474 = vmatprep.mubr.f32.mxu0 %v1179_v43 }
 0x20c   :  { %1475 = vmatmul.mubr.f32.gmra.mrb[24].mxu0 %v1180_v44 }
 0x20d   :  { %1477 = vmatprep.mubr.f32.mxu0 %v1181_v45 }
 0x210   :  { %1478 = vmatmul.mubr.f32.gmra.mrb[26].mxu0 %v1182_v46 }
 0x211   :  { %1480 = vmatprep.mubr.f32.mxu0 %v1183_v47 }
 0x214   :  { %1481 = vmatmul.mubr.f32.gmra.mrb[28].mxu0 %v1184_v48 }
 0x215   :  { %1483 = vmatprep.mubr.f32.mxu0 %v1185_v49 }
 0x218   :  { %1484 = vmatmul.mubr.f32.gmra.mrb[30].mxu0 %v1186_v50  ;;  %v730_v50 = vpop.permute.xlu1 %729 }
 0x219   :  { %1518 = vmatprep.mubr.f32.mxu0 %v1203_v51 }
 0x2cf   :  { %v1464_v59 = vpop.f32.mrb[16].mxu0 }
 0x2d0   :  { %v804_v60 = vadd.f32 %v1464_v59, %v660_v53  ;;  %v798_v61 = vpop.f32.mrb[17].mxu0  ;;  %v725_v53 = vpop.permute.xlu0 %724 }
 0x2d1   :  { %v799_v62 = vadd.f32 %v798_v61, %v655_v54  ;;  %v1204_v61 = vld [vmem:[%s2083_s2 + $0x108] sm:$0xff] }
 0x2d2   :  { %v878_v63 = vmax.f32 %v804_v60, 0.0 }
 0x2d3   :  { %v877_v1 = vmax.f32 %v799_v62, 0.0  ;;  %v1467_v2 = vpop.f32.mrb[18].mxu0  ;;  %v1210_v62 = vld [vmem:[%s2083_s2 + $0x138] sm:$0xff] }
 0x2d4   :  { %v814_v4 = vadd.f32 %v1467_v2, %v670_v55  ;;  %v808_v5 = vpop.f32.mrb[19].mxu0  ;;  %v1206_v2 = vld [vmem:[%s2083_s2 + $0x118] sm:$0xff] }
 0x2d5   :  { %v1606_v6 = vpack.c.bf16 %v878_v63, %v877_v1  ;;  %v809_v7 = vadd.f32 %v808_v5, %v665_v56  ;;  %v1211_v63 = vld [vmem:[%s2083_s2 + $0x140] sm:$0xff]  ;;  %v1212_v1 = vld [vmem:[%s2083_s2 + $0x148] sm:$0xff]  ;;  %v1214_v5 = vld [vmem:[%s2083_s2 + $0x158] sm:$0xff] }
 0x2d6   :  { %v880_v8 = vmax.f32 %v814_v4, 0.0  ;;  %v1207_v4 = vld [vmem:[%s2083_s2 + $0x120] sm:$0xff] }
 0x2d7   :  { %v879_v9 = vmax.f32 %v809_v7, 0.0  ;;  %v1470_v10 = vpop.f32.mrb[20].mxu0  ;;  %1607 = vmatprep.subr.bf16.mxu0 %v1606_v6  ;;  %1638 = vmatprep.subr.bf16.mxu1 %v1606_v6  ;;  %v1215_v7 = vld [vmem:[%s2083_s2 + $0x160] sm:$0xff] }
 0x2d8   :  { %v824_v11 = vadd.f32 %v1470_v10, %v680_v57  ;;  %v818_v12 = vpop.f32.mrb[21].mxu0  ;;  %1609 = vmatpush3.bf16.msra.mxu0 %v1606_v6  ;;  %1646 = vmatpush3.bf16.msra.mxu1 %v1606_v6  ;;  %v1208_v6 = vld [vmem:[%s2083_s2 + $0x128] sm:$0xff]  ;;  %v1218_v10 = vld [vmem:[%s2083_s2 + $0x178] sm:$0xff] }
 0x2d9   :  { %v1610_v14 = vpack.c.bf16 %v880_v8, %v879_v9  ;;  %v819_v15 = vadd.f32 %v818_v12, %v675_v58  ;;  %v1216_v8 = vld [vmem:[%s2083_s2 + $0x168] sm:$0xff]  ;;  %v1217_v9 = vld [vmem:[%s2083_s2 + $0x170] sm:$0xff] }
 0x2da   :  { %v882_v17 = vmax.f32 %v824_v11, 0.0  ;;  %v930_v11 = vpop.permute.xlu0 %929 }
 0x2db   :  { %v881_v18 = vmax.f32 %v819_v15, 0.0  ;;  %v1473_v19 = vpop.f32.mrb[22].mxu0  ;;  %1611 = vmatprep.subr.bf16.mxu0 %v1610_v14  ;;  %1639 = vmatprep.subr.bf16.mxu1 %v1610_v14 }
 0x2dc   :  { %v834_v20 = vadd.f32 %v1473_v19, %v690_v0  ;;  %v828_v21 = vpop.f32.mrb[23].mxu0  ;;  %1613 = vmatpush3.bf16.msra.mxu0 %v1610_v14  ;;  %1647 = vmatpush3.bf16.msra.mxu1 %v1610_v14  ;;  %v1205_v0 = vld [vmem:[%s2083_s2 + $0x110] sm:$0xff] }
 0x2dd   :  { %v1614_v22 = vpack.c.bf16 %v882_v17, %v881_v18  ;;  %v829_v23 = vadd.f32 %v828_v21, %v685_v3  ;;  %v1213_v3 = vld [vmem:[%s2083_s2 + $0x150] sm:$0xff] }
 0x2de   :  { %v884_v24 = vmax.f32 %v834_v20, 0.0 }
 0x2df   :  { %v883_v26 = vmax.f32 %v829_v23, 0.0  ;;  %v1476_v27 = vpop.f32.mrb[24].mxu0  ;;  %1615 = vmatprep.subr.bf16.mxu0 %v1614_v22  ;;  %1640 = vmatprep.subr.bf16.mxu1 %v1614_v22 }
 0x2e0   :  { %v844_v29 = vadd.f32 %v1476_v27, %v700_v13  ;;  %v838_v30 = vpop.f32.mrb[25].mxu0  ;;  %1617 = vmatpush3.bf16.msra.mxu0 %v1614_v22  ;;  %1648 = vmatpush3.bf16.msra.mxu1 %v1614_v22 }
 0x2e1   :  { %v1618_v31 = vpack.c.bf16 %v884_v24, %v883_v26  ;;  %v839_v32 = vadd.f32 %v838_v30, %v695_v16 }
 0x2e2   :  { %v886_v33 = vmax.f32 %v844_v29, 0.0 }
 0x2e3   :  { %v885_v34 = vmax.f32 %v839_v32, 0.0  ;;  %v1479_v35 = vpop.f32.mrb[26].mxu0  ;;  %1619 = vmatprep.subr.bf16.mxu0 %v1618_v31  ;;  %1641 = vmatprep.subr.bf16.mxu1 %v1618_v31 }
 0x2e4   :  { %v854_v36 = vadd.f32 %v1479_v35, %v710_v25  ;;  %v848_v37 = vpop.f32.mrb[27].mxu0  ;;  %1621 = vmatpush3.bf16.msra.mxu0 %v1618_v31  ;;  %1649 = vmatpush3.bf16.msra.mxu1 %v1618_v31 }
 0x2e5   :  { %v1622_v39 = vpack.c.bf16 %v886_v33, %v885_v34  ;;  %v849_v40 = vadd.f32 %v848_v37, %v705_v28 }
 0x2e6   :  { %v888_v42 = vmax.f32 %v854_v36, 0.0 }
 0x2e7   :  { %v887_v43 = vmax.f32 %v849_v40, 0.0  ;;  %v1482_v44 = vpop.f32.mrb[28].mxu0  ;;  %1623 = vmatprep.subr.bf16.mxu0 %v1622_v39  ;;  %1642 = vmatprep.subr.bf16.mxu1 %v1622_v39 }
 0x2e8   :  { %v864_v45 = vadd.f32 %v1482_v44, %v720_v38  ;;  %v858_v46 = vpop.f32.mrb[29].mxu0  ;;  %1625 = vmatpush3.bf16.msra.mxu0 %v1622_v39  ;;  %1650 = vmatpush3.bf16.msra.mxu1 %v1622_v39 }
 0x2e9   :  { %v1626_v47 = vpack.c.bf16 %v888_v42, %v887_v43  ;;  %v859_v48 = vadd.f32 %v858_v46, %v715_v41 }
 0x2ea   :  { %v890_v49 = vmax.f32 %v864_v45, 0.0 }
 0x2eb   :  { %v889_v51 = vmax.f32 %v859_v48, 0.0  ;;  %v1485_v52 = vpop.f32.mrb[30].mxu0  ;;  %1627 = vmatprep.subr.bf16.mxu0 %v1626_v47  ;;  %1643 = vmatprep.subr.bf16.mxu1 %v1626_v47 }
 0x2ec   :  { %v874_v54 = vadd.f32 %v1485_v52, %v730_v50  ;;  %v868_v55 = vpop.f32.mrb[31].mxu0  ;;  %1629 = vmatpush3.bf16.msra.mxu0 %v1626_v47  ;;  %1651 = vmatpush3.bf16.msra.mxu1 %v1626_v47 }
 0x2ed   :  { %v1630_v56 = vpack.c.bf16 %v890_v49, %v889_v51  ;;  %v869_v57 = vadd.f32 %v868_v55, %v725_v53 }
 0x2ee   :  { %v892_v58 = vmax.f32 %v874_v54, 0.0 }
 0x2ef   :  { %v891_v59 = vmax.f32 %v869_v57, 0.0  ;;  %1631 = vmatprep.subr.bf16.mxu0 %v1630_v56  ;;  %1644 = vmatprep.subr.bf16.mxu1 %v1630_v56 }
 0x2f0   :  { %1633 = vmatpush3.bf16.msra.mxu0 %v1630_v56  ;;  %1652 = vmatpush3.bf16.msra.mxu1 %v1630_v56 }
 0x2f1   :  { %v1634_v60 = vpack.c.bf16 %v892_v58, %v891_v59 }
 0x2f3   :  { %1635 = vmatprep.subr.bf16.mxu0 %v1634_v60  ;;  %1645 = vmatprep.subr.bf16.mxu1 %v1634_v60 }
 0x2f4   :  { %1637 = vmatpush3.bf16.msra.mxu0 %v1634_v60  ;;  %1653 = vmatpush3.bf16.msra.mxu1 %v1634_v60 }
 0x2f7   :  { %1519 = vmatmul.mubr.f32.vlgmr.msra.gmra.mrb[32].mxu0 %v1204_v61  ;;  %1528 = vmatmul.mubr.f32.vlgmr.msra.gmra.mrb[16].mxu1 %v1210_v62 }
 0x2f8   :  { %1530 = vmatprep.mubr.f32.mxu1 %v1211_v63  ;;  %1521 = vmatprep.mubr.f32.mxu0 %v1205_v0 }
 0x2fb   :  { %1531 = vmatmul.mubr.f32.gmra.mrb[18].mxu1 %v1212_v1  ;;  %1522 = vmatmul.mubr.f32.gmra.mrb[34].mxu0 %v1206_v2 }
 0x2fc   :  { %1533 = vmatprep.mubr.f32.mxu1 %v1213_v3  ;;  %1524 = vmatprep.mubr.f32.mxu0 %v1207_v4 }
 0x2ff   :  { %1534 = vmatmul.mubr.f32.gmra.mrb[20].mxu1 %v1214_v5  ;;  %1525 = vmatmul.mubr.f32.gmra.mrb[36].mxu0 %v1208_v6 }
 0x300   :  { %1536 = vmatprep.mubr.f32.mxu1 %v1215_v7 }
 0x303   :  { %1537 = vmatmul.mubr.f32.gmra.mrb[22].mxu1 %v1216_v8 }
 0x304   :  { %1539 = vmatprep.mubr.f32.mxu1 %v1217_v9 }
 0x307   :  { %1540 = vmatmul.mubr.f32.gmra.mrb[24].mxu1 %v1218_v10 }
 0x3ca   :  { %v1520_v12 = vpop.f32.mrb[32].mxu0  ;;  %v1529_v13 = vpop.f32.mrb[16].mxu1 }
 0x3cb   :  { %v1058_v14 = vpop.f32.mrb[33].mxu0  ;;  %v1083_v15 = vpop.f32.mrb[17].mxu1 }
 0x3cc   :  { %v1059_v16 = vadd.f32 %v1058_v14, %v930_v11 }
 0x3ce   :  { %v1532_v17 = vpop.f32.mrb[18].mxu1  ;;  %v1523_v18 = vpop.f32.mrb[34].mxu0  ;;  %1123 = vst.msk [vmem:[#allocation2] sm:$0x1] %vm1122_vm1, %v1059_v16 }
 0x3cf   :  { %v1091_v19 = vpop.f32.mrb[19].mxu1  ;;  %v1067_v20 = vpop.f32.mrb[35].mxu0 }
 0x3d0   :  { %1669 = shalt.err (!%p1666_p4)
}
 0x3d1   :  { %s1670_s22 = scalar_lea.hbm %s2085_s4, 16 }
 0x3d2   :  { %p1671_p5 = scmp.ne.s32.totalorder %s2085_s4, %s1670_s22  ;;  %p1674_p6 = scmp.lt.u32.totalorder %s1670_s22, %s2085_s4 }
 0x3d4   :  { %p1676_p7 = pnand %p1674_p6, %p1671_p5 }
 0x3d6   :  { %1679 = shalt.err (!%p1676_p7)
}
 0x3d7   :  { %1133 = dma.vmem_to_hbm [thread:$0]  %s1131_s18, 16, %s2085_s4, [#allocation3]   ;;  %v1535_v21 = vpop.f32.mrb[20].mxu1  ;;  %v1526_v22 = vpop.f32.mrb[36].mxu0 }
 0x3d8   :  { %v1099_v23 = vpop.f32.mrb[21].mxu1  ;;  %v1075_v24 = vpop.f32.mrb[37].mxu0 }
 0x3d9   :  { %v1538_v25 = vpop.f32.mrb[22].mxu1 }
 0x3da   :  { %v1107_v26 = vpop.f32.mrb[23].mxu1 }
 0x3db   :  { %v1541_v27 = vpop.f32.mrb[24].mxu1 }
 0x3dc   :  { %v1115_v28 = vpop.f32.mrb[25].mxu1 }
 0x3dd   :  { %1680 = dma.done.wait [#allocation3], 16  }
 0x3de   :  { %1681 = vsyncadd [#allocation3], 4294967280 }
 0x3df   :  { %1137 = vsyncpa [#allocation3], 1 }

</bundles_post_ra>
